<compile_context>
chip_gen: v7x
topology: tpu7x:2x2x1
jax: 0.10.0
libtpu: 0.0.40
codegen_flags: <defaults>
</compile_context>

<pallas_src>
import functools

import numpy as np
import jax
import jax.numpy as jnp
from jax import lax
from jax.experimental import pallas as pl
from jax.experimental.pallas import tpu as pltpu

_UNROLL = 8


def _round_up(x, m):
    return ((x + m - 1) // m) * m


def _scatter_kernel(nchunks_ref, lidx_ref, pf_ref, out_ref, scratch,
                    *, tile_cols, seg_cap, n_tiles):
    # nchunks_ref : SMEM (n_seg,)           int32  unrolled-chunk count per segment
    # lidx_ref    : SMEM (n_seg * seg_cap,) int32  tile-local scatter row (or DUMP)
    # pf_ref      : VMEM (seg_cap, C)       f32    this (batch, tile)'s packed pillars
    # out_ref     : VMEM (C, tile_cols)     f32    this (batch, tile)'s output block
    # scratch     : VMEM (tile_rows, C)     f32    rows >= tile_cols are a junk dump area
    b = pl.program_id(0)
    t = pl.program_id(1)
    seg = b * n_tiles + t
    base = seg * seg_cap

    # Zero only the live rows; dump rows are never read or written back.
    scratch[pl.ds(0, tile_cols), :] = jnp.zeros(
        (tile_cols, scratch.shape[1]), scratch.dtype)

    def chunk_body(c, carry):
        off = pl.multiple_of(c * _UNROLL, _UNROLL)
        # Branchless unrolled scatter: padded tail entries carry row == DUMP
        # (== tile_cols) and land in the junk area.  Last write wins for
        # duplicate cells (stable sort preserved original pillar order).
        for u in range(_UNROLL):
            m = off + u
            row = lidx_ref[base + m]
            scratch[pl.ds(row, 1), :] = pf_ref[pl.ds(m, 1), :]
        return carry

    lax.fori_loop(0, nchunks_ref[seg], chunk_body, 0)

    # (TS, C) -> (C, TS): channel-major, lane-dense output block store.
    out_ref[...] = jnp.transpose(scratch[pl.ds(0, tile_cols), :], (1, 0))


def point_pillar_scatter(pillar_features, voxel_coords, *, num_features,
                         grid_size, batch_size=None, tile_cols=2048,
                         max_pillars_per_tile=None):
    """PointPillarScatter forward. Returns (B, C*nz, ny, nx) spatial features.

    Pass `batch_size` and `max_pillars_per_tile` to keep the wrapper free of
    host syncs (jit-friendly); both otherwise fall back to data-derived values
    that mirror the torch module's `.item()` behaviour.
    """
    nx, ny, nz = grid_size
    assert nz == 1
    C = num_features
    M = pillar_features.shape[0]
    S = nz * ny * nx
    dtype = pillar_features.dtype

    coords = jnp.asarray(voxel_coords, dtype=jnp.int32)
    batch_ids = coords[:, 0]
    flat_idx = coords[:, 1] + coords[:, 2] * nx + coords[:, 3]

    if batch_size is None:
        # Matches torch `coords[:, 0].max().item() + 1` (host sync).
        batch_size = int(jax.device_get(jnp.max(batch_ids))) + 1
    B = int(batch_size)

    # ---- spatial tiling ---------------------------------------------------
    if S <= tile_cols:
        TS = S                                    # single tile == full dim
    else:
        TS = _round_up(min(tile_cols, S), 128)    # lane-dense multiple of 128
    n_tiles = int(pl.cdiv(S, TS))
    S_pad = n_tiles * TS
    n_seg = B * n_tiles
    DUMP = TS                                     # junk scratch row for padding

    # ---- sort pillars by (batch, tile) and pack densely per segment -------
    tile_ids = flat_idx // TS
    local_rows = (flat_idx - tile_ids * TS).astype(jnp.int32)
    seg_ids = (batch_ids * n_tiles + tile_ids).astype(jnp.int32)

    order = jnp.argsort(seg_ids, stable=True)     # stable -> last-write-wins kept
    seg_s = seg_ids[order]
    rows_s = local_rows[order]
    pf_s = pillar_features[order]

    counts_raw = jnp.bincount(seg_ids, length=n_seg).astype(jnp.int32)

    if max_pillars_per_tile is None:
        # Host sync (same cost class as the torch `.item()` call); pass a
        # static cap in production to keep the wrapper jit/fusion friendly.
        seg_cap = int(jax.device_get(jnp.max(counts_raw))) if M > 0 else 0
    else:
        seg_cap = int(max_pillars_per_tile)
    seg_cap = max(_round_up(max(seg_cap, 1), _UNROLL), _UNROLL)

    counts = jnp.minimum(counts_raw, seg_cap)
    n_chunks = ((counts + _UNROLL - 1) // _UNROLL).astype(jnp.int32)

    starts = jnp.concatenate(
        [jnp.zeros((1,), jnp.int32),
         jnp.cumsum(counts_raw).astype(jnp.int32)[:-1]])
    pos_in_seg = jnp.arange(M, dtype=jnp.int32) - starts[seg_s]
    in_cap = pos_in_seg < seg_cap                 # overflow pillars are dropped
    dest = jnp.where(in_cap, seg_s * seg_cap + pos_in_seg, n_seg * seg_cap)

    # TODO(synk): for very large M, slice the local-index table per tile
    # instead of scalar-prefetching the whole 1-D array into SMEM (1-D SMEM
    # arrays pad to the next power of two).
    lidx_packed = jnp.full((n_seg * seg_cap,), DUMP, jnp.int32).at[dest].set(
        rows_s, mode="drop")
    pf_packed = jnp.zeros((n_seg * seg_cap, C), dtype).at[dest].set(
        pf_s, mode="drop").reshape(n_seg, seg_cap, C)

    # ---- VMEM budget (lane-padded) and per-chip clamp ----------------------
    scratch_rows = _round_up(TS, 8) + _UNROLL     # dump rows live at index >= TS
    itemsize = jnp.dtype(dtype).itemsize
    c_lane = _round_up(C, 128)
    c_sub = _round_up(C, 8)
    ts_lane = _round_up(TS, 128)
    needed = (
        2 * _round_up(seg_cap, 8) * c_lane        # double-buffered pillar block
        + 2 * c_sub * ts_lane                     # double-buffered output block
        + _round_up(scratch_rows, 8) * c_lane     # scatter scratch
        + c_sub * ts_lane                         # transpose temporary
    ) * itemsize

    cap = 64 << 20                                # v7x physical VMEM as safe floor
    try:
        cap = int(getattr(pltpu.get_tpu_info(), "vmem_capacity_bytes", cap))
    except Exception:
        pass
    vmem_limit = int(min(max(2 * needed, 16 << 20), int(cap * 0.9)))

    kernel = functools.partial(_scatter_kernel, tile_cols=TS, seg_cap=seg_cap,
                               n_tiles=n_tiles)

    out = pl.pallas_call(
        kernel,
        out_shape=jax.ShapeDtypeStruct((B, C, S_pad), dtype),
        grid_spec=pltpu.PrefetchScalarGridSpec(
            num_scalar_prefetch=2,                # n_chunks, lidx_packed -> SMEM
            grid=(B, n_tiles),
            in_specs=[
                pl.BlockSpec((None, seg_cap, C),
                             lambda b, t, nchunks, lidx: (b * n_tiles + t, 0, 0)),
            ],
            out_specs=pl.BlockSpec((None, C, TS),
                                   lambda b, t, nchunks, lidx: (b, 0, t)),
            scratch_shapes=[pltpu.VMEM((scratch_rows, C), dtype)],
        ),
        compiler_params=pltpu.CompilerParams(
            dimension_semantics=("parallel", "parallel"),
            vmem_limit_bytes=vmem_limit,
        ),
    )(n_chunks, lidx_packed, pf_packed)

    if S_pad != S:
        out = out[:, :, :S]
    # view as (B, C*nz, ny, nx) -- pure reshape, matches torch .view
    return out.reshape(B, C * nz, ny, nx)


def _reference(pf, coords, C, nx, ny, nz):
    # Explicit in-order loop => unambiguous last-write-wins for duplicate cells.
    pf = np.asarray(pf)
    coords = np.asarray(coords)
    B = int(coords[:, 0].max()) + 1
    out = np.zeros((B, C, nz * ny * nx), dtype=pf.dtype)
    for i in range(coords.shape[0]):
        b, z, y, x = (int(v) for v in coords[i])
        out[b, :, z + y * nx + x] = pf[i]
    return out.reshape(B, C * nz, ny, nx)


if __name__ == "__main__":
    # model_cfg: num_features=64, grid_size=(nx, ny, nz)=(16, 16, 1)
    C = 64
    nx, ny, nz = 16, 16, 1
    B = 2
    M_per = 12

    key = jax.random.PRNGKey(0)
    k_feat, k_pos0, k_pos1 = jax.random.split(key, 3)

    # unique (y, x) positions per batch ...
    coords_list = []
    for b, kp in zip(range(B), (k_pos0, k_pos1)):
        flat = np.asarray(jax.random.permutation(kp, ny * nx))[:M_per]
        y = flat // nx
        x = flat % nx
        z = np.zeros_like(x)
        bcol = np.full_like(x, b)
        coords_list.append(np.stack([bcol, z, y, x], axis=1))
    voxel_coords = np.concatenate(coords_list, axis=0)
    # ... plus one duplicated cell (last pillar repeats batch 0's first cell)
    # to lock in last-write-wins semantics.
    voxel_coords = np.concatenate(
        [voxel_coords, voxel_coords[:1]], axis=0).astype(np.int32)
    M = voxel_coords.shape[0]

    pillar_features = jax.random.normal(k_feat, (M, C), dtype=jnp.float32)

    spatial_features = point_pillar_scatter(
        pillar_features, voxel_coords,
        num_features=C, grid_size=(nx, ny, nz), batch_size=B,
        tile_cols=128,   # force n_tiles=2 so the tiled path is exercised
    )
    spatial_features = jax.block_until_ready(spatial_features)

    ref = _reference(pillar_features, voxel_coords, C, nx, ny, nz)
    assert spatial_features.shape == (B, C * nz, ny, nx)
    assert np.allclose(np.asarray(spatial_features), ref, atol=1e-6), \
        "mismatch vs reference"

    print("KERNEL_OK")
</pallas_src>

<mosaic_0001>
module attributes {stable_mosaic.version = 11 : i64} {
  func.func @_scatter_kernel(%arg0: i32, %arg1: i32, %arg2: memref<4xi32, #tpu.memory_space<smem>>, %arg3: memref<32xi32, #tpu.memory_space<smem>>, %arg4: memref<1x8x64xf32, #tpu.memory_space<vmem>>, %arg5: memref<1x64x128xf32, #tpu.memory_space<vmem>>, %arg6: memref<136x64xf32, #tpu.memory_space<vmem>>) attributes {dimension_semantics = [#tpu.dimension_semantics<parallel>, #tpu.dimension_semantics<parallel>], iteration_bounds = array<i64: 2, 2>, scalar_prefetch = 2 : i64, scratch_operands = 1 : i64, tpu.core_type = #tpu.core_type<tc>, window_params = [{transform_indices = @transform_0, window_bounds = array<i64: 1, 8, 64>}, {transform_indices = @transform_1, window_bounds = array<i64: 1, 64, 128>}]} {
    %c2_i32 = arith.constant 2 : i32
    %0 = arith.muli %arg0, %c2_i32 : i32
    %1 = arith.addi %0, %arg1 : i32
    %c8_i32 = arith.constant 8 : i32
    %2 = arith.muli %1, %c8_i32 : i32
    %cst = arith.constant 0.000000e+00 : f32
    %3 = vector.broadcast %cst : f32 to vector<128x64xf32>
    %c0 = arith.constant 0 : index
    %c0_0 = arith.constant 0 : index
    %4 = vector.load %arg6[%c0, %c0_0] : memref<136x64xf32, #tpu.memory_space<vmem>>, vector<128x64xf32>
    tpu.vector_store %arg6[%c0, %c0_0], %3 {strides = array<i32>} : memref<136x64xf32, #tpu.memory_space<vmem>>, vector<128x64xf32>,
    %5 = arith.index_cast %1 : i32 to index
    %6 = memref.load %arg2[%5] : memref<4xi32, #tpu.memory_space<smem>>
    %c0_i32 = arith.constant 0 : i32
    %c0_i32_1 = arith.constant 0 : i32
    %7 = arith.subi %6, %c0_i32_1 : i32
    %8 = arith.addi %c0_i32_1, %7 : i32
    %c1_i32 = arith.constant 1 : i32
    scf.for %arg7 = %c0_i32_1 to %8 step %c1_i32  : i32 {
      %c8_i32_7 = arith.constant 8 : i32
      %14 = arith.muli %arg7, %c8_i32_7 : i32
      %15 = tpu.assume_multiple %14, 8 : i32
      %c0_i32_8 = arith.constant 0 : i32
      %16 = arith.addi %15, %c0_i32_8 : i32
      %17 = arith.addi %2, %16 : i32
      %18 = arith.index_cast %17 : i32 to index
      %19 = memref.load %arg3[%18] : memref<32xi32, #tpu.memory_space<smem>>
      %c0_9 = arith.constant 0 : index
      %20 = arith.index_cast %16 : i32 to index
      %c0_10 = arith.constant 0 : index
      %21 = vector.load %arg4[%c0_9, %20, %c0_10] : memref<1x8x64xf32, #tpu.memory_space<vmem>>, vector<1x1x64xf32>
      %22 = vector.shape_cast %21 : vector<1x1x64xf32> to vector<1x64xf32>
      %23 = arith.index_cast %19 : i32 to index
      %c0_11 = arith.constant 0 : index
      %24 = vector.load %arg6[%23, %c0_11] : memref<136x64xf32, #tpu.memory_space<vmem>>, vector<1x64xf32>
      tpu.vector_store %arg6[%23, %c0_11], %22 {strides = array<i32>} : memref<136x64xf32, #tpu.memory_space<vmem>>, vector<1x64xf32>,
      %c1_i32_12 = arith.constant 1 : i32
      %25 = arith.addi %15, %c1_i32_12 : i32
      %26 = arith.addi %2, %25 : i32
      %27 = arith.index_cast %26 : i32 to index
      %28 = memref.load %arg3[%27] : memref<32xi32, #tpu.memory_space<smem>>
      %c0_13 = arith.constant 0 : index
      %29 = arith.index_cast %25 : i32 to index
      %c0_14 = arith.constant 0 : index
      %30 = vector.load %arg4[%c0_13, %29, %c0_14] : memref<1x8x64xf32, #tpu.memory_space<vmem>>, vector<1x1x64xf32>
      %31 = vector.shape_cast %30 : vector<1x1x64xf32> to vector<1x64xf32>
      %32 = arith.index_cast %28 : i32 to index
      %c0_15 = arith.constant 0 : index
      %33 = vector.load %arg6[%32, %c0_15] : memref<136x64xf32, #tpu.memory_space<vmem>>, vector<1x64xf32>
      tpu.vector_store %arg6[%32, %c0_15], %31 {strides = array<i32>} : memref<136x64xf32, #tpu.memory_space<vmem>>, vector<1x64xf32>,
      %c2_i32_16 = arith.constant 2 : i32
      %34 = arith.addi %15, %c2_i32_16 : i32
      %35 = arith.addi %2, %34 : i32
      %36 = arith.index_cast %35 : i32 to index
      %37 = memref.load %arg3[%36] : memref<32xi32, #tpu.memory_space<smem>>
      %c0_17 = arith.constant 0 : index
      %38 = arith.index_cast %34 : i32 to index
      %c0_18 = arith.constant 0 : index
      %39 = vector.load %arg4[%c0_17, %38, %c0_18] : memref<1x8x64xf32, #tpu.memory_space<vmem>>, vector<1x1x64xf32>
      %40 = vector.shape_cast %39 : vector<1x1x64xf32> to vector<1x64xf32>
      %41 = arith.index_cast %37 : i32 to index
      %c0_19 = arith.constant 0 : index
      %42 = vector.load %arg6[%41, %c0_19] : memref<136x64xf32, #tpu.memory_space<vmem>>, vector<1x64xf32>
      tpu.vector_store %arg6[%41, %c0_19], %40 {strides = array<i32>} : memref<136x64xf32, #tpu.memory_space<vmem>>, vector<1x64xf32>,
      %c3_i32 = arith.constant 3 : i32
      %43 = arith.addi %15, %c3_i32 : i32
      %44 = arith.addi %2, %43 : i32
      %45 = arith.index_cast %44 : i32 to index
      %46 = memref.load %arg3[%45] : memref<32xi32, #tpu.memory_space<smem>>
      %c0_20 = arith.constant 0 : index
      %47 = arith.index_cast %43 : i32 to index
      %c0_21 = arith.constant 0 : index
      %48 = vector.load %arg4[%c0_20, %47, %c0_21] : memref<1x8x64xf32, #tpu.memory_space<vmem>>, vector<1x1x64xf32>
      %49 = vector.shape_cast %48 : vector<1x1x64xf32> to vector<1x64xf32>
      %50 = arith.index_cast %46 : i32 to index
      %c0_22 = arith.constant 0 : index
      %51 = vector.load %arg6[%50, %c0_22] : memref<136x64xf32, #tpu.memory_space<vmem>>, vector<1x64xf32>
      tpu.vector_store %arg6[%50, %c0_22], %49 {strides = array<i32>} : memref<136x64xf32, #tpu.memory_space<vmem>>, vector<1x64xf32>,
      %c4_i32 = arith.constant 4 : i32
      %52 = arith.addi %15, %c4_i32 : i32
      %53 = arith.addi %2, %52 : i32
      %54 = arith.index_cast %53 : i32 to index
      %55 = memref.load %arg3[%54] : memref<32xi32, #tpu.memory_space<smem>>
      %c0_23 = arith.constant 0 : index
      %56 = arith.index_cast %52 : i32 to index
      %c0_24 = arith.constant 0 : index
      %57 = vector.load %arg4[%c0_23, %56, %c0_24] : memref<1x8x64xf32, #tpu.memory_space<vmem>>, vector<1x1x64xf32>
      %58 = vector.shape_cast %57 : vector<1x1x64xf32> to vector<1x64xf32>
      %59 = arith.index_cast %55 : i32 to index
      %c0_25 = arith.constant 0 : index
      %60 = vector.load %arg6[%59, %c0_25] : memref<136x64xf32, #tpu.memory_space<vmem>>, vector<1x64xf32>
      tpu.vector_store %arg6[%59, %c0_25], %58 {strides = array<i32>} : memref<136x64xf32, #tpu.memory_space<vmem>>, vector<1x64xf32>,
      %c5_i32 = arith.constant 5 : i32
      %61 = arith.addi %15, %c5_i32 : i32
      %62 = arith.addi %2, %61 : i32
      %63 = arith.index_cast %62 : i32 to index
      %64 = memref.load %arg3[%63] : memref<32xi32, #tpu.memory_space<smem>>
      %c0_26 = arith.constant 0 : index
      %65 = arith.index_cast %61 : i32 to index
      %c0_27 = arith.constant 0 : index
      %66 = vector.load %arg4[%c0_26, %65, %c0_27] : memref<1x8x64xf32, #tpu.memory_space<vmem>>, vector<1x1x64xf32>
      %67 = vector.shape_cast %66 : vector<1x1x64xf32> to vector<1x64xf32>
      %68 = arith.index_cast %64 : i32 to index
      %c0_28 = arith.constant 0 : index
      %69 = vector.load %arg6[%68, %c0_28] : memref<136x64xf32, #tpu.memory_space<vmem>>, vector<1x64xf32>
      tpu.vector_store %arg6[%68, %c0_28], %67 {strides = array<i32>} : memref<136x64xf32, #tpu.memory_space<vmem>>, vector<1x64xf32>,
      %c6_i32 = arith.constant 6 : i32
      %70 = arith.addi %15, %c6_i32 : i32
      %71 = arith.addi %2, %70 : i32
      %72 = arith.index_cast %71 : i32 to index
      %73 = memref.load %arg3[%72] : memref<32xi32, #tpu.memory_space<smem>>
      %c0_29 = arith.constant 0 : index
      %74 = arith.index_cast %70 : i32 to index
      %c0_30 = arith.constant 0 : index
      %75 = vector.load %arg4[%c0_29, %74, %c0_30] : memref<1x8x64xf32, #tpu.memory_space<vmem>>, vector<1x1x64xf32>
      %76 = vector.shape_cast %75 : vector<1x1x64xf32> to vector<1x64xf32>
      %77 = arith.index_cast %73 : i32 to index
      %c0_31 = arith.constant 0 : index
      %78 = vector.load %arg6[%77, %c0_31] : memref<136x64xf32, #tpu.memory_space<vmem>>, vector<1x64xf32>
      tpu.vector_store %arg6[%77, %c0_31], %76 {strides = array<i32>} : memref<136x64xf32, #tpu.memory_space<vmem>>, vector<1x64xf32>,
      %c7_i32 = arith.constant 7 : i32
      %79 = arith.addi %15, %c7_i32 : i32
      %80 = arith.addi %2, %79 : i32
      %81 = arith.index_cast %80 : i32 to index
      %82 = memref.load %arg3[%81] : memref<32xi32, #tpu.memory_space<smem>>
      %c0_32 = arith.constant 0 : index
      %83 = arith.index_cast %79 : i32 to index
      %c0_33 = arith.constant 0 : index
      %84 = vector.load %arg4[%c0_32, %83, %c0_33] : memref<1x8x64xf32, #tpu.memory_space<vmem>>, vector<1x1x64xf32>
      %85 = vector.shape_cast %84 : vector<1x1x64xf32> to vector<1x64xf32>
      %86 = arith.index_cast %82 : i32 to index
      %c0_34 = arith.constant 0 : index
      %87 = vector.load %arg6[%86, %c0_34] : memref<136x64xf32, #tpu.memory_space<vmem>>, vector<1x64xf32>
      tpu.vector_store %arg6[%86, %c0_34], %85 {strides = array<i32>} : memref<136x64xf32, #tpu.memory_space<vmem>>, vector<1x64xf32>,
    }
    %c0_2 = arith.constant 0 : index
    %c0_3 = arith.constant 0 : index
    %9 = vector.load %arg6[%c0_2, %c0_3] : memref<136x64xf32, #tpu.memory_space<vmem>>, vector<128x64xf32>
    %10 = tpu.transpose %9, [1, 0] : vector<128x64xf32> -> vector<64x128xf32>
    %c0_4 = arith.constant 0 : index
    %c0_5 = arith.constant 0 : index
    %c0_6 = arith.constant 0 : index
    %11 = vector.load %arg5[%c0_4, %c0_5, %c0_6] : memref<1x64x128xf32, #tpu.memory_space<vmem>>, vector<1x64x128xf32>
    %12 = vector.shape_cast %11 : vector<1x64x128xf32> to vector<64x128xf32>
    %13 = vector.shape_cast %10 : vector<64x128xf32> to vector<1x64x128xf32>
    tpu.vector_store %arg5[%c0_4, %c0_5, %c0_6], %13 {strides = array<i32>} : memref<1x64x128xf32, #tpu.memory_space<vmem>>, vector<1x64x128xf32>,
    return
  }
  func.func @transform_0(%arg0: i32, %arg1: i32, %arg2: memref<4xi32, #tpu.memory_space<smem>>, %arg3: memref<32xi32, #tpu.memory_space<smem>>) -> (i32, i32, i32) {
    %c2_i32 = arith.constant 2 : i32
    %0 = arith.muli %arg0, %c2_i32 : i32
    %1 = arith.addi %0, %arg1 : i32
    %c0_i32 = arith.constant 0 : i32
    %c0_i32_0 = arith.constant 0 : i32
    %c0_i32_1 = arith.constant 0 : i32
    return %1, %c0_i32, %c0_i32_0 : i32, i32, i32
  }
  func.func @transform_1(%arg0: i32, %arg1: i32, %arg2: memref<4xi32, #tpu.memory_space<smem>>, %arg3: memref<32xi32, #tpu.memory_space<smem>>) -> (i32, i32, i32) {
    %c0_i32 = arith.constant 0 : i32
    %c0_i32_0 = arith.constant 0 : i32
    return %arg0, %c0_i32, %arg1 : i32, i32, i32
  }
}

</mosaic_0001>

<bundles_post_ra>
// kernel: tpu_custom_call.1
= control target key start
LH: loop header
LB: loop body
LE: loop exit
PB: predicated region body
PF: predicated region fallthrough
CT: control target
= control target key end

     0   :  { %s1147_s0 = inlined_call_operand.hbm [shape: s32[4], index: 0, kind: input, shape index: {}]   ;;  %s1148_s2 = inlined_call_operand.hbm [shape: f32[4,8,64], index: 2, kind: input, shape index: {}]   ;;  %s1149_s3 = inlined_call_operand.hbm [shape: f32[2,64,256], index: 3, kind: output, shape index: {}]   ;;  %s1150_s1 = inlined_call_operand.vmem [shape: s32[32], index: 1, kind: input, shape index: {}]  }
   0x1   :  { %1160 = sst [smem:[#allocation21_spill]] %s1148_s2  ;;  %s594_s14 = scalar_lea.hbm %s1147_s0, 16 }
   0x2   :  { %p595_p0 = scmp.ne.s32.totalorder %s1147_s0, %s594_s14  ;;  %p598_p1 = scmp.lt.u32.totalorder %s594_s14, %s1147_s0 }
   0x4   :  { %p600_p2 = pnand %p598_p1, %p595_p0 }
   0x6   :  { %603 = shalt.err (!%p600_p2)  }
   0x7   :  { %s780_s19 = smov [#allocation4]   ;;  %s10_s24 = sshll.u32 %s1150_s1, 4  ;;  %s11_s24 = int_to_ptr.vmem [resolvable:$true] %s10_s24 }
   0x8   :  { %9 = dma.hbm_to_smem %s1147_s0, 16, %s780_s19, [#allocation3] }
   0x9   :  { %s604_s25 = scalar_lea.vmem %s11_s24, 16  ;;  %p609_p4 = scmp.lt.s32.totalorder %s11_s24, %s11_s24 }
   0xa   :  { %p605_p3 = scmp.ne.s32.totalorder %s11_s24, %s604_s25  ;;  %p610_p5 = scmp.lt.s32.totalorder %s604_s25, %s604_s25 }
   0xc   :  { %p611_p6 = por %p610_p5, %p609_p4 }
   0xe   :  { %p612_p7 = pnand %p611_p6, %p605_p3 }
  0x10   :  { %615 = shalt.err (!%p612_p7)  }
  0x11   :  { %s781_s26 = smov [#allocation5]  }
  0x12   :  { %13 = dma.vmem_to_smem %s11_s24, 16, %s781_s26, [#allocation3] }
  0x13   :  { %722 = dma.done.wait [#allocation3], 32 }
  0x14   :  { %723 = vsyncadd [#allocation3], 4294967264 }
  0x15   :  { %15 = sfence }
  0x16   :  { %16 = vsyncpa [#allocation7], 0 }
  0x17   :  { %18 = vsyncpa [#allocation7 + $0x1], 0 }
  0x18   :  { %19 = vsyncpa [#allocation8], 0 }
  0x19   :  { %21 = vsyncpa [#allocation8 + $0x1], 0  ;;  %s823_s0 = smov 0   ;;  %s825_s1 = smov 0  }
  0x1a   :  { %s827_s27 = smov 0   ;;  %s829_s28 = smov 0  }
  0x1b   :  { %s831_s29 = smov 0   ;;  %s833_s30 = smov 0  }
  0x1c   :  { %s835_s4 = smov 0   ;;  %s837_s5 = smov 0  }
  0x1d   :  { %s839_s6 = smov 0   ;;  %s841_s7 = smov 0  }
  0x1e   :  { %s843_s8 = smov 0  }
  0x1f LB: > { %1161 = sst [smem:[#allocation13_spill]] %s750_s29  ;;  %s443_s9 = sadd.s32 4294967295, %s774_s8   ;;  %s774_s8 = sphi %s843_s8, %s27_s8   ;;  %s770_s7 = sphi %s841_s7, %s1188_s7   ;;  %s766_s6 = sphi %s839_s6, %s1187_s6   ;;  %s762_s5 = sphi %s837_s5, %s1186_s5   ;;  %s758_s4 = sphi %s835_s4, %s1185_s4   ;;  %s754_s30 = sphi %s833_s30, %s1184_s30   ;;  %s750_s29 = sphi %s831_s29, %s1183_s29   ;;  %s746_s28 = sphi %s829_s28, %s1182_s28   ;;  %s742_s27 = sphi %s827_s27, %s1191_s27   ;;  %s738_s1 = sphi %s825_s1, %s1190_s1   ;;  %s734_s0 = sphi %s823_s0, %s1189_s0  }
  0x20   : > { %1162 = sst [smem:[#allocation14_spill]] %s754_s30  ;;  %s444_s10 = sadd.s32 4294967294, %s774_s8  }
  0x21   : > { %1163 = sst [smem:[#allocation15_spill]] %s766_s6  ;;  %s36_s11 = sadd.s32 1, %s766_s6 }
  0x22   : > { %1164 = sst [smem:[#allocation16_spill]] %s770_s7  ;;  %s39_s12 = sadd.s32 1, %s770_s7 }
  0x23   : > { %p37_p8 = scmp.ge.s32.totalorder %s36_s11, 2  ;;  %s445_s13 = sshll.u32 %s770_s7, 1 }
  0x24   : > { %s882_s14 = sadd.s32 %s766_s6, %s445_s13  ;;  %s50_s15 = sadd.s32 1, %s754_s30 }
  0x25   : > { %s1193_s11 = smov (%p37_p8, %s36_s11), 0  ;;  %s1195_s12 = smov (!%p37_p8, %s39_s12), %s770_s7 }
  0x26   : > { %1165 = sst [smem:[#allocation17_spill]] %s1193_s11  ;;  %p57_p9 = scmp.ne.s32.totalorder %s754_s30, %s750_s29 }
  0x27   : > { %p58_p10 = scmp.eq.s32.totalorder %s774_s8, 0  ;;  %p41_p11 = scmp.ge.s32.totalorder %s1195_s12, 2 }
  0x28   : > { %p63_p12 = scmp.ne.s32.totalorder %s750_s29, %s746_s28  ;;  %p64_p0 = scmp.eq.s32.totalorder %s443_s9, 0 }
  0x29   : > { %p892_p13 = por %p58_p10, %p57_p9  ;;  %s1197_s12 = smov (%p41_p11, %s1195_s12), 0 }
  0x2a   : > { %1167 = sst [smem:[#allocation18_spill]] %s1197_s12  ;;  %p900_p1 = por %p64_p0, %p63_p12 }
  0x2b   : > { %s74_s18 = ssub.s32 %s766_s6, %s1193_s11  ;;  %s446_s19 = sshll.u32 %s1197_s12, 1 }
  0x2c   : > { %s73_s20 = ssub.s32 %s770_s7, %s1197_s12  ;;  %s46_s21 = sadd.s32 %s446_s19, %s1193_s11 }
  0x2d   : > { %s75_s22 = sor.u32 %s74_s18, %s73_s20  ;;  %s47_s23 = ssub.s32 %s882_s14, %s46_s21 }
  0x2e   : > { %p76_p2 = scmp.eq.s32.totalorder %s75_s22, 0  ;;  %p48_p3 = scmp.eq.s32.totalorder %s47_s23, 0 }
  0x2f   : > { %s78_s24 = sadd.s32 1, %s742_s27  ;;  %p88_p4 = scmp.ne.s32.totalorder %s742_s27, %s738_s1 }
  0x30   : > { %s913_s25 = scalar_select %p76_p2, %s742_s27, %s78_s24  }
  0x31   : > { %s916_s26 = scalar_select %p48_p3, %s754_s30, %s50_s15  }
  0x32   : > { %p89_p5 = scmp.eq.s32.totalorder %s443_s9, 3  ;;  %p94_p6 = scmp.ne.s32.totalorder %s738_s1, %s734_s0 }
  0x33   : > { %1169 = sst [smem:[#allocation19_spill]] %s916_s26  ;;  %p95_p7 = scmp.eq.s32.totalorder %s444_s10, 3 }
  0x34   : > { %p926_p8 = por %p89_p5, %p88_p4  ;;  %p490_p10 = scmp.lt.s32.totalorder %s774_s8, 4 }
  0x35   : > { %p930_p9 = por %p95_p7, %p94_p6  ;;  %s115_s18 = sand.u32 1, %s754_s30  }
  0x36   : > { %s1170_s28 = scalar_select %p926_p8, 1, 0 }
  0x37   : > { %s1171_s13 = scalar_select %p930_p9, 1, 0 }
  0x38   : > { %s451_s15 = sshll.u32 %s882_s14, 7  ;;  %s449_s19 = sshll.u32 %s115_s18, 3 }
  0x39   : > { %s1172_s2 = sld [smem:[#allocation21_spill]]  ;;  %s119_s9 = scalar_lea.vmem [#allocation6], %s449_s19 }
  0x3a   : > { %s128_s10 = sshll.u32 %s119_s9, 4  ;;  %p944_p11 = pnand %p490_p10, %p892_p13  ;;  %s948_s10 = int_to_ptr.vmem [resolvable:$true] %s128_s10 }
  0x3b   : > { %s116_s14 = scalar_lea.sflag [#allocation7], %s115_s18 }
  0x3c   : > { %p618_p3 = pneg %p944_p11 }
  0x3f   : > { %s940_s22 = scalar_lea.hbm %s1172_s2, %s451_s15  ;;  %s621_s19 = scalar_lea.hbm %s1172_s2, 512 }
  0x40   : > { %s616_s24 = scalar_lea.hbm %s940_s22, 128  ;;  %p622_p13 = scmp.lt.u32.totalorder %s940_s22, %s1172_s2 }
  0x41   : > { %p617_p2 = scmp.ne.s32.totalorder %s940_s22, %s616_s24  ;;  %p623_p6 = scmp.lt.u32.totalorder %s621_s19, %s616_s24 }
  0x42   : > { %p625_p10 = scmp.lt.u32.totalorder %s616_s24, %s940_s22 }
  0x43   : > { %p619_p4 = pnand %p618_p3, %p617_p2  ;;  %p624_p7 = por %p623_p6, %p622_p13 }
  0x45   : > { %p620_p5 = pneg %p619_p4  ;;  %p626_p12 = por %p625_p10, %p624_p7 }
  0x47   : > { %p627_p0 = pnand %p626_p12, %p620_p5 }
  0x49   : > { %630 = shalt.err (!%p627_p0)
}
  0x4a   : > { %s631_s18 = scalar_lea.vmem %s948_s10, 128  ;;  %s782_s9 = smov [#allocation6]  }
  0x4b   : > { %p632_p2 = scmp.ne.s32.totalorder %s948_s10, %s631_s18  ;;  %s636_s16 = sshll.u32 %s782_s9, 4  ;;  %s637_s16 = int_to_ptr.vmem [resolvable:$false] %s636_s16 }
  0x4c   : > { %s638_s15 = scalar_lea.vmem %s637_s16, 256  ;;  %p639_p8 = scmp.lt.s32.totalorder %s948_s10, %s637_s16 }
  0x4d   : > { %p634_p4 = pnand %p632_p2, %p618_p3  ;;  %p640_p13 = scmp.lt.s32.totalorder %s638_s15, %s631_s18 }
  0x4f   : > { %p635_p9 = pneg %p634_p4  ;;  %p641_p6 = por %p640_p13, %p639_p8 }
  0x51   : > { %p642_p7 = pnand %p641_p6, %p635_p9 }
  0x53   : > { %645 = shalt.err (!%p642_p7)
}
  0x54   : > { %485 = dma.hbm_to_vmem [thread:$0]  (!%p944_p11), %s940_s22, 128, %s948_s10, %s116_s14  }
  0x55   : > { %p1174_p12 = scmp.lt.s32.totalorder %s774_s8, 5  ;;  %p1175_p0 = scmp.ge.s32.totalorder %s774_s8, 1 }
  0x57   : > { %p134_p3 = pnand %p1175_p0, %p1174_p12 }
  0x59   : > { %137 = sbr.rel (%p134_p3) target bundleno = 320 (0x140), region = 24 }
  0x60   : > { %s139_s24 = sand.u32 1, %s750_s29  }
  0x61   : > { %s982_s19 = sshll.u32 %s139_s24, 3  ;;  %s140_s20 = scalar_lea.sflag [#allocation7], %s139_s24 }
  0x62   : > { %1176 = sst [smem:[#allocation20_spill]] %s982_s19 }
  0x63   : > { %725 = dma.done.wait (%p900_p1), %s140_s20, 128  }
  0x64   : > { %727 = vsyncadd (%p900_p1), %s140_s20, 4294967168  ;;  %s455_s22 = sshll.u32 %s762_s5, 1  ;;  %s1152_s10 = sand.u32 1, %s738_s1   ;;  %vm167_vm0 = vcmask 523264   ;;  %v783_v0 = vmov 0.0  }
  0x65   : > { %s165_s23 = sadd.s32 %s758_s4, %s455_s22  ;;  %s454_s14 = sshll.u32 %s1152_s10, 6  ;;  %168 = vst.msk [vmem:[#allocation2] sm:$0xff] %vm167_vm0, %v783_v0  ;;  %169 = vst.msk [vmem:[#allocation2 + $0x8] sm:$0xff] %vm167_vm0, %v783_v0 }
  0x66   : > { %170 = vst.msk [vmem:[#allocation2 + $0x10] sm:$0xff] %vm167_vm0, %v783_v0  ;;  %171 = vst.msk [vmem:[#allocation2 + $0x18] sm:$0xff] %vm167_vm0, %v783_v0  ;;  %s1010_s17 = sshll.u32 %s165_s23, 3  ;;  %s1012_s18 = sld [smem:[#allocation4 + %s165_s23]] }
  0x67   : > { %172 = vst.msk [vmem:[#allocation2 + $0x20] sm:$0xff] %vm167_vm0, %v783_v0  ;;  %173 = vst.msk [vmem:[#allocation2 + $0x28] sm:$0xff] %vm167_vm0, %v783_v0  ;;  %s1014_s9 = scalar_lea.vmem [#allocation9], %s454_s14 }
  0x68   : > { %174 = vst.msk [vmem:[#allocation2 + $0x30] sm:$0xff] %vm167_vm0, %v783_v0  ;;  %175 = vst.msk [vmem:[#allocation2 + $0x38] sm:$0xff] %vm167_vm0, %v783_v0 }
  0x69   : > { %176 = vst.msk [vmem:[#allocation2 + $0x40] sm:$0xff] %vm167_vm0, %v783_v0  ;;  %177 = vst.msk [vmem:[#allocation2 + $0x48] sm:$0xff] %vm167_vm0, %v783_v0 }
  0x6a   : > { %178 = vst.msk [vmem:[#allocation2 + $0x50] sm:$0xff] %vm167_vm0, %v783_v0  ;;  %179 = vst.msk [vmem:[#allocation2 + $0x58] sm:$0xff] %vm167_vm0, %v783_v0 }
  0x6b   : > { %180 = vst.msk [vmem:[#allocation2 + $0x60] sm:$0xff] %vm167_vm0, %v783_v0  ;;  %181 = vst.msk [vmem:[#allocation2 + $0x68] sm:$0xff] %vm167_vm0, %v783_v0 }
  0x6c   : > { %182 = vst.msk [vmem:[#allocation2 + $0x70] sm:$0xff] %vm167_vm0, %v783_v0  ;;  %183 = vst.msk [vmem:[#allocation2 + $0x78] sm:$0xff] %vm167_vm0, %v783_v0  ;;  %p457_p1 = scmp.le.s32.totalorder %s1012_s18, 0 }
  0x6d   : > { %s1017_s16 = smov (!%p457_p1), 0  }
  0x6e   : > { %405 = sbr.rel (%p457_p1) target bundleno = 143 (0x8f), region = 86 }
  0x75 LB: >> { %s1177_s19 = sld [smem:[#allocation20_spill]]  ;;  %s1023_s15 = sshll.u32 %s778_s16, 3  ;;  %vm197_vm1 = vcmask 516096   ;;  %s778_s16 = sphi %s1017_s16, %s188_s16  }
  0x76   : >> { %s192_s24 = sadd.s32 %s1023_s15, %s1010_s17  ;;  %s199_s23 = sadd.s32 1, %s1023_s15 }
  0x77   : >> { %s193_s22 = sld [smem:[#allocation5 + %s192_s24]]  ;;  %s200_s14 = sadd.s32 %s1010_s17, %s199_s23 }
  0x78   : >> { %s206_s10 = sadd.s32 2, %s1023_s15  ;;  %s201_s2 = sld [smem:[#allocation5 + %s200_s14]] }
  0x79   : >> { %s207_s12 = sadd.s32 %s1010_s17, %s206_s10  ;;  %s213_s7 = sadd.s32 3, %s1023_s15 }
  0x7a   : >> { %s208_s11 = sld [smem:[#allocation5 + %s207_s12]]  ;;  %s227_s10 = sadd.s32 5, %s1023_s15 }
  0x7b   : >> { %s1178_s21 = scalar_lea.vmem [#allocation6], %s1177_s19  ;;  %s214_s19 = sadd.s32 %s1010_s17, %s213_s7 }
  0x7c   : >> { %s1030_s20 = scalar_lea.vmem %s1178_s21, %s1023_s15 [#allocation6]  ;;  %s220_s21 = sadd.s32 4, %s1023_s15 }
  0x7d   : >> { %v195_v1 = vld [vmem:[%s1030_s20] sm:$0x1]  ;;  %s215_s6 = sld [smem:[#allocation5 + %s214_s19]]  ;;  %s221_s26 = sadd.s32 %s1010_s17, %s220_s21  ;;  %v460_v2 = vld [vmem:[%s1030_s20 + $0x1] sm:$0x1] }
  0x7e   : >> { %s222_s24 = sld [smem:[#allocation5 + %s221_s26]]  ;;  %s196_s23 = scalar_lea.vmem [#allocation2], %s193_s22  ;;  %v462_v3 = vld [vmem:[%s1030_s20 + $0x2] sm:$0x1]  ;;  %v464_v4 = vld [vmem:[%s1030_s20 + $0x3] sm:$0x1] }
  0x7f   : >> { %198 = vst.msk [vmem:[%s196_s23] sm:$0x1] %vm197_vm1, %v195_v1  ;;  %s234_s12 = sadd.s32 6, %s1023_s15  ;;  %s228_s14 = sadd.s32 %s1010_s17, %s227_s10  ;;  %v466_v5 = vld [vmem:[%s1030_s20 + $0x4] sm:$0x1] }
  0x80   : >> { %s204_s30 = scalar_lea.vmem [#allocation2], %s201_s2  ;;  %s229_s7 = sld [smem:[#allocation5 + %s228_s14]]  ;;  %v468_v6 = vld [vmem:[%s1030_s20 + $0x5] sm:$0x1]  ;;  %v470_v7 = vld [vmem:[%s1030_s20 + $0x6] sm:$0x1] }
  0x81   : >> { %205 = vst.msk [vmem:[%s204_s30] sm:$0x1] %vm197_vm1, %v460_v2  ;;  %s211_s19 = scalar_lea.vmem [#allocation2], %s208_s11  ;;  %s235_s26 = sadd.s32 %s1010_s17, %s234_s12  ;;  %v472_v8 = vld [vmem:[%s1030_s20 + $0x7] sm:$0x1] }
  0x82   : >> { %212 = vst.msk [vmem:[%s211_s19] sm:$0x1] %vm197_vm1, %v462_v3  ;;  %s241_s21 = sadd.s32 7, %s1023_s15  ;;  %s236_s22 = sld [smem:[#allocation5 + %s235_s26]] }
  0x83   : >> { %s218_s23 = scalar_lea.vmem [#allocation2], %s215_s6  ;;  %s242_s29 = sadd.s32 %s1010_s17, %s241_s21 }
  0x84   : >> { %219 = vst.msk [vmem:[%s218_s23] sm:$0x1] %vm197_vm1, %v464_v4  ;;  %s225_s10 = scalar_lea.vmem [#allocation2], %s222_s24  ;;  %s243_s2 = sld [smem:[#allocation5 + %s242_s29]] }
  0x85   : >> { %226 = vst.msk [vmem:[%s225_s10] sm:$0x1] %vm197_vm1, %v466_v5  ;;  %s188_s16 = sadd.s32 1, %s778_s16  }
  0x86   : >> { %s232_s30 = scalar_lea.vmem [#allocation2], %s229_s7  ;;  %p187_p8 = scmp.ge.s32.totalorder %s188_s16, %s1012_s18 }
  0x87   : >> { %233 = vst.msk [vmem:[%s232_s30] sm:$0x1] %vm197_vm1, %v468_v6 }
  0x88   : >> { %s239_s11 = scalar_lea.vmem [#allocation2], %s236_s22  ;;  %190 = sbr.rel (!%p187_p8) target bundleno = 117 (0x75), region = 92 }
  0x89   : >> { %240 = vst.msk [vmem:[%s239_s11] sm:$0x1] %vm197_vm1, %v470_v7 }
  0x8a   : >> { %s246_s12 = scalar_lea.vmem [#allocation2], %s243_s2 }
  0x8b   : >> { %247 = vst.msk [vmem:[%s246_s12] sm:$0x1] %vm197_vm1, %v472_v8 }
  0x8f PF: > { %s474_s29 = sshll.u32 %s762_s5, 4  ;;  %s319_s18 = sshll.u32 %s1014_s9, 4  ;;  %s1081_s18 = int_to_ptr.vmem [resolvable:$true] %s319_s18 }
  0x90   : > { %s316_s6 = sadd.s32 %s758_s4, %s474_s29  ;;  %s1179_s5 = sand.u32 1, %s738_s1  }
  0x91   : > { %s475_s17 = sshll.u32 %s316_s6, 7  ;;  %s1086_s4 = scalar_lea.sflag [#allocation8], %s1179_s5 }
  0x92   : > { %v248_v9 = vld [vmem:[#allocation2] sm:$0xff]  ;;  %v249_v10 = vld [vmem:[#allocation2 + $0x8] sm:$0xff]  ;;  %v250_v11 = vld [vmem:[#allocation2 + $0x10] sm:$0xff]  ;;  %s1079_s20 = scalar_lea.hbm %s1149_s3, %s475_s17  ;;  %s646_s24 = scalar_lea.vmem %s1081_s18, 1024 }
  0x93   : > { %264 = vxpose.xlu0.b32.start [1/16] (narrow) %v248_v9, 64  ;;  %v251_v12 = vld [vmem:[#allocation2 + $0x18] sm:$0xff]  ;;  %v252_v13 = vld [vmem:[#allocation2 + $0x20] sm:$0xff]  ;;  %v253_v14 = vld [vmem:[#allocation2 + $0x28] sm:$0xff]  ;;  %p647_p9 = scmp.ne.s32.totalorder %s1081_s18, %s646_s24  ;;  %p1180_p11 = scmp.ne.s32.totalorder %s1170_s28, 0 }
  0x94   : > { %v254_v15 = vld [vmem:[#allocation2 + $0x30] sm:$0xff]  ;;  %v255_v16 = vld [vmem:[#allocation2 + $0x38] sm:$0xff]  ;;  %v256_v17 = vld [vmem:[#allocation2 + $0x40] sm:$0xff]  ;;  %s784_s14 = smov [#allocation9]  }
  0x95   : > { %v257_v18 = vld [vmem:[#allocation2 + $0x48] sm:$0xff]  ;;  %v258_v19 = vld [vmem:[#allocation2 + $0x50] sm:$0xff]  ;;  %v259_v20 = vld [vmem:[#allocation2 + $0x58] sm:$0xff]  ;;  %p648_p5 = pnand %p647_p9, %p1180_p11  ;;  %s650_s7 = sshll.u32 %s784_s14, 4  ;;  %s651_s7 = int_to_ptr.vmem [resolvable:$false] %s650_s7 }
  0x96   : > { %v260_v21 = vld [vmem:[#allocation2 + $0x60] sm:$0xff]  ;;  %v261_v22 = vld [vmem:[#allocation2 + $0x68] sm:$0xff]  ;;  %v262_v23 = vld [vmem:[#allocation2 + $0x70] sm:$0xff]  ;;  %s652_s19 = scalar_lea.vmem %s651_s7, 2048  ;;  %p653_p2 = scmp.lt.s32.totalorder %s1081_s18, %s651_s7 }
  0x97   : > { %265 = vxpose.xlu0.b32.cont [2/16] (narrow) %v249_v10, 64  ;;  %v263_v24 = vld [vmem:[#allocation2 + $0x78] sm:$0xff]  ;;  %p649_p10 = pneg %p648_p5  ;;  %p654_p4 = scmp.lt.s32.totalorder %s652_s19, %s646_s24 }
  0x99   : > { %p655_p13 = por %p654_p4, %p653_p2 }
  0x9b   : > { %266 = vxpose.xlu0.b32.cont [3/16] (narrow) %v250_v11, 64  ;;  %p656_p6 = pnand %p655_p13, %p649_p10 }
  0x9f   : > { %267 = vxpose.xlu0.b32.cont [4/16] (narrow) %v251_v12, 64 }
  0xa3   : > { %268 = vxpose.xlu0.b32.cont [5/16] (narrow) %v252_v13, 64 }
  0xa7   : > { %269 = vxpose.xlu0.b32.cont [6/16] (narrow) %v253_v14, 64 }
  0xab   : > { %270 = vxpose.xlu0.b32.cont [7/16] (narrow) %v254_v15, 64 }
  0xaf   : > { %271 = vxpose.xlu0.b32.cont [8/16] (narrow) %v255_v16, 64 }
  0xb3   : > { %272 = vxpose.xlu0.b32.cont [9/16] (narrow) %v256_v17, 64 }
  0xb7   : > { %273 = vxpose.xlu0.b32.cont [10/16] (narrow) %v257_v18, 64 }
  0xbb   : > { %274 = vxpose.xlu0.b32.cont [11/16] (narrow) %v258_v19, 64 }
  0xbf   : > { %275 = vxpose.xlu0.b32.cont [12/16] (narrow) %v259_v20, 64 }
  0xc3   : > { %276 = vxpose.xlu0.b32.cont [13/16] (narrow) %v260_v21, 64 }
  0xc7   : > { %277 = vxpose.xlu0.b32.cont [14/16] (narrow) %v261_v22, 64 }
  0xcb   : > { %278 = vxpose.xlu0.b32.cont [15/16] (narrow) %v262_v23, 64 }
  0xcf   : > { %279 = vxpose.xlu0.b32.end [16/16] (narrow) %v263_v24, 64 }
 0x113   : > { %v280_v25 = vpop.trf.xlu0 }
 0x114   : > { %296 = vst [vmem:[%s1014_s9] sm:$0xff] %v280_v25 }
 0x117   : > { %v281_v26 = vpop.trf.xlu0 }
 0x118   : > { %297 = vst [vmem:[%s1014_s9 + $0x8] sm:$0xff] %v281_v26 }
 0x11b   : > { %v282_v27 = vpop.trf.xlu0 }
 0x11c   : > { %298 = vst [vmem:[%s1014_s9 + $0x10] sm:$0xff] %v282_v27 }
 0x11f   : > { %v283_v28 = vpop.trf.xlu0 }
 0x120   : > { %299 = vst [vmem:[%s1014_s9 + $0x18] sm:$0xff] %v283_v28 }
 0x123   : > { %v284_v29 = vpop.trf.xlu0 }
 0x124   : > { %300 = vst [vmem:[%s1014_s9 + $0x20] sm:$0xff] %v284_v29 }
 0x127   : > { %v285_v30 = vpop.trf.xlu0 }
 0x128   : > { %301 = vst [vmem:[%s1014_s9 + $0x28] sm:$0xff] %v285_v30 }
 0x12b   : > { %v286_v31 = vpop.trf.xlu0 }
 0x12c   : > { %302 = vst [vmem:[%s1014_s9 + $0x30] sm:$0xff] %v286_v31 }
 0x12f   : > { %v287_v32 = vpop.trf.xlu0 }
 0x130   : > { %303 = vst [vmem:[%s1014_s9 + $0x38] sm:$0xff] %v287_v32 }
 0x131   : > { %659 = shalt.err (!%p656_p6)
}
 0x132   : > { %s660_s9 = scalar_lea.hbm %s1079_s20, 1024  ;;  %s664_s22 = scalar_lea.hbm %s1149_s3, 4096 }
 0x133   : > { %p661_p7 = scmp.ne.s32.totalorder %s1079_s20, %s660_s9  ;;  %p665_p3 = scmp.lt.u32.totalorder %s1079_s20, %s1149_s3 }
 0x134   : > { %p666_p1 = scmp.lt.u32.totalorder %s664_s22, %s660_s9  ;;  %p668_p9 = scmp.lt.u32.totalorder %s660_s9, %s1079_s20 }
 0x135   : > { %p662_p12 = pnand %p661_p7, %p1180_p11 }
 0x136   : > { %p667_p8 = por %p666_p1, %p665_p3 }
 0x137   : > { %p663_p0 = pneg %p662_p12 }
 0x138   : > { %p669_p5 = por %p668_p9, %p667_p8 }
 0x13a   : > { %p670_p10 = pnand %p669_p5, %p663_p0 }
 0x13c   : > { %673 = shalt.err (!%p670_p10)
}
 0x13d   : > { %s785_s2 = smov 128   ;;  %s786_s30 = smov 256  }
 0x13e   : > { %s787_s11 = smov 8  }
 0x13f   : > { %480 = dma.vmem_to_hbm [thread:$0]  (%p1180_p11), %s1081_s18, 1024, %s1079_s20, %s1086_s4, %s785_s2, %s786_s30, %s787_s11  }
 0x140 PF: > { %p491_p2 = scmp.ge.s32.totalorder %s774_s8, 2  ;;  %s334_s12 = sand.u32 1, %s734_s0  }
 0x141   : > { %p1181_p4 = scmp.ne.s32.totalorder %s1171_s13, 0  ;;  %s335_s29 = scalar_lea.sflag [#allocation8], %s334_s12 }
 0x143   : > { %p487_p13 = pnand %p491_p2, %p1181_p4 }
 0x145   : > { %729 = dma.done.wait (!%p487_p13), %s335_s29, 1024  }
 0x146   : > { %731 = vsyncadd (!%p487_p13), %s335_s29, 4294966272  ;;  %s27_s8 = sadd.s32 1, %s774_s8   ;;  %s1182_s28 = sld [smem:[#allocation13_spill]] }
 0x147   : > { %p24_p6 = scmp.ge.s32.totalorder %s27_s8, 6   ;;  %s1183_s29 = sld [smem:[#allocation14_spill]] }
 0x148   : > { %s1184_s30 = sld [smem:[#allocation19_spill]]  ;;  %s1185_s4 = sld [smem:[#allocation15_spill]] }
 0x149   : > { %s1186_s5 = sld [smem:[#allocation16_spill]]  ;;  %s1187_s6 = sld [smem:[#allocation17_spill]] }
 0x14a   : > { %s1188_s7 = sld [smem:[#allocation18_spill]]  ;;  %s1189_s0 = smov %s738_s1 }
 0x14b   : > { %s1190_s1 = smov %s742_s27  ;;  %s1191_s27 = smov %s913_s25 }
 0x14c   :  { %26 = sbr.rel (!%p24_p6) target bundleno = 31 (0x1f), region = 103 }
 0x153   :  { %340 = vsyncpa [#allocation7], 1 }
 0x154   :  { %342 = vsyncpa [#allocation7 + $0x1], 1 }
 0x155   :  { %343 = vsyncpa [#allocation8], 1 }
 0x156   :  { %345 = vsyncpa [#allocation8 + $0x1], 1 }

</bundles_post_ra>
